<compile_context>
chip_gen: v5e
topology: v5e:2x2
jax: 0.10.0
libtpu: 0.0.40
codegen_flags: <defaults>
</compile_context>

<pallas_src>
import functools

import jax
import jax.numpy as jnp
from jax.experimental import pallas as pl
from jax.experimental.pallas import tpu as pltpu


def _round_up(x, m):
    return (x + m - 1) // m * m


def _physical_vmem_bytes():
    """Best-effort physical VMEM size (generation-aware tiling / limits)."""
    try:
        return int(pltpu.get_tpu_info().vmem_capacity_bytes)
    except Exception:
        pass
    try:
        kind = jax.devices()[0].device_kind.lower()
        if "v7" in kind:
            return 64 * 1024 * 1024          # v7x: 64 MiB per TensorCore
    except Exception:
        pass
    return 128 * 1024 * 1024                 # v5e / v6e default


# ----------------------------------------------------------------------------
# Pallas kernel: fused 3-layer MLP encoder with K-tiled (streamed) first layer
# ----------------------------------------------------------------------------
def _mlp_encoder_kernel(x_ref, w1_ref, b1_ref, w2_ref, b2_ref, w3_ref, b3_ref,
                        o_ref, h1_acc):
    """o = relu(relu(x@W1+b1)@W2+b2)@W3 + b3 for one (batch-tile, k-tile)."""
    k = pl.program_id(1)

    @pl.when(k == 0)
    def _():
        h1_acc[...] = jnp.zeros_like(h1_acc)

    # x arrives f32 straight from HBM; cast the tile to bf16 on the VPU (it
    # hides under the MXU / DMA), then stream the (tb,tk)x(tk,H1p) partial
    # product into the f32 VMEM accumulator.
    x_tile = x_ref[...].astype(jnp.bfloat16)
    h1_acc[...] += jnp.dot(x_tile, w1_ref[...],
                           preferred_element_type=jnp.float32)

    # Finalize once the contraction over DT is complete: bias+ReLU in f32,
    # remaining two (small, VMEM-resident) layers, single lane-dense store.
    @pl.when(k == pl.num_programs(1) - 1)
    def _():
        h1 = jnp.maximum(h1_acc[...] + b1_ref[...], 0.0).astype(jnp.bfloat16)
        h2 = jnp.dot(h1, w2_ref[...], preferred_element_type=jnp.float32)
        h2 = jnp.maximum(h2 + b2_ref[...], 0.0).astype(jnp.bfloat16)
        z = jnp.dot(h2, w3_ref[...], preferred_element_type=jnp.float32)
        o_ref[...] = (z + b3_ref[...]).astype(o_ref.dtype)


# ----------------------------------------------------------------------------
# One-time parameter packing (pad to lane-dense 128 multiples, cast to bf16)
# ----------------------------------------------------------------------------
def pack_encoder_params(params):
    """Pad hidden/latent/DT dims to multiples of 128 and cast MXU operands to
    bf16 ONCE.  Zero-padded weight columns/rows + zero-padded biases are a
    numerical no-op (relu(0)=0, zero rows contribute nothing downstream)."""
    DT, H1 = params["w1"].shape
    H2 = params["w2"].shape[1]
    H = params["w3"].shape[1]
    DTp = _round_up(DT, 128)
    H1p, H2p, Hp = (_round_up(d, 128) for d in (H1, H2, H))
    return {
        "w1": jnp.pad(params["w1"].astype(jnp.bfloat16),
                      ((0, DTp - DT), (0, H1p - H1))),
        "b1": jnp.pad(params["b1"].astype(jnp.float32), ((0, 0), (0, H1p - H1))),
        "w2": jnp.pad(params["w2"].astype(jnp.bfloat16),
                      ((0, H1p - H1), (0, H2p - H2))),
        "b2": jnp.pad(params["b2"].astype(jnp.float32), ((0, 0), (0, H2p - H2))),
        "w3": jnp.pad(params["w3"].astype(jnp.bfloat16),
                      ((0, H2p - H2), (0, Hp - H))),
        "b3": jnp.pad(params["b3"].astype(jnp.float32), ((0, 0), (0, Hp - H))),
    }


# ----------------------------------------------------------------------------
# Fused encoder forward (jit-wrapped by the module)
# ----------------------------------------------------------------------------
def mlp_encoder_forward(data, packed, *, out_features, batch_tile=None):
    """data: [B, D, T] float tensor; packed: pre-padded bf16/f32 params.

    Returns [B, out_features] float32 latent representation.
    """
    B = data.shape[0]
    x = data.reshape(B, -1).astype(jnp.float32)
    DT = x.shape[1]

    w1, b1 = packed["w1"], packed["b1"]
    w2, b2 = packed["w2"], packed["b2"]
    w3, b3 = packed["w3"], packed["b3"]
    DTp, H1p = w1.shape
    H2p = w2.shape[1]
    Hp = w3.shape[1]
    if DTp != _round_up(DT, 128):
        raise ValueError("packed params do not match input feature size")

    phys_vmem = _physical_vmem_bytes()

    # Batch tile: a single tile for small B (no pointless W1 re-streaming on
    # single-TensorCore chips); for big batches grow toward the roofline
    # crossover.  32-row multiples (sublane-friendly for f32 and bf16).
    if batch_tile is None:
        tb = min(_round_up(B, 32), 512)
    else:
        tb = batch_tile
    Bp = _round_up(B, tb)
    n_btiles = Bp // tb

    # K tile for the streamed layer-1 contraction: DT padded only to a 128
    # multiple; tk is the largest power-of-two (<=2048) dividing DTp that
    # still leaves a comfortable VMEM margin for the double-buffered slabs.
    tk = 128
    for cand in (2048, 1024, 512, 256, 128):
        if DTp % cand == 0:
            tk = cand
            break
    while tk > 128 and (2 * tk * H1p * 2 + 2 * tb * tk * 4) > phys_vmem // 4:
        tk //= 2
    nk = DTp // tk

    # Pad x only when actually needed (zero-width pad elided under jit anyway).
    if Bp != B or DTp != DT:
        x = jnp.pad(x, ((0, Bp - B), (0, DTp - DT)))

    grid = (n_btiles, nk)      # reduction (K) axis last, marked "arbitrary"

    # VMEM budget: pipelined x/W1/out buffers, single-buffered resident W2/W3,
    # f32 accumulator scratch, plus the epilogue temporaries (bf16 x cast,
    # h1 bf16, h2 f32+bf16, z f32).
    budget = (2 * tb * tk * 4                       # x tile (f32, 2 bufs)
              + 2 * tk * H1p * 2                    # W1 tile (bf16, 2 bufs)
              + (H1p * H2p + H2p * Hp) * 2          # W2, W3 (single-buffered)
              + 2 * (H1p + H2p + Hp) * 4            # biases
              + 2 * tb * Hp * 4                     # out tile (f32, 2 bufs)
              + tb * H1p * 4                        # accumulator scratch
              + tb * tk * 2                         # bf16 cast of x tile
              + tb * H1p * 2 + tb * H2p * 6 + tb * Hp * 4)   # epilogue temps
    vmem_limit = int(min(max(int(budget * 1.3) + (4 << 20), 32 << 20),
                         int(phys_vmem * 0.75)))

    flops = 2 * Bp * (DTp * H1p + H1p * H2p + H2p * Hp)
    bytes_accessed = (Bp * DTp * 4                  # x read once (f32)
                      + n_btiles * DTp * H1p * 2    # W1 streamed per batch tile
                      + (H1p * H2p + H2p * Hp) * 2  # W2, W3 once
                      + (H1p + H2p + Hp) * 4        # biases once
                      + Bp * Hp * 4)                # output

    const = lambda i, k: (0, 0)                     # fetched once, never change
    resident = pl.Buffered(buffer_count=1)          # no dead second buffer

    out = pl.pallas_call(
        _mlp_encoder_kernel,
        out_shape=jax.ShapeDtypeStruct((Bp, Hp), jnp.float32),
        grid_spec=pltpu.PrefetchScalarGridSpec(
            num_scalar_prefetch=0,
            grid=grid,
            in_specs=[
                pl.BlockSpec((tb, tk), lambda i, k: (i, k)),        # x (f32)
                pl.BlockSpec((tk, H1p), lambda i, k: (k, 0)),       # W1 stream
                pl.BlockSpec((1, H1p), const),                      # b1
                pl.BlockSpec((H1p, H2p), const,
                             pipeline_mode=resident),               # W2
                pl.BlockSpec((1, H2p), const),                      # b2
                pl.BlockSpec((H2p, Hp), const,
                             pipeline_mode=resident),               # W3
                pl.BlockSpec((1, Hp), const),                       # b3
            ],
            out_specs=pl.BlockSpec((tb, Hp), lambda i, k: (i, 0)),
            scratch_shapes=[pltpu.VMEM((tb, H1p), jnp.float32)],
        ),
        compiler_params=pltpu.CompilerParams(
            dimension_semantics=("parallel", "arbitrary"),
            vmem_limit_bytes=vmem_limit),
        cost_estimate=pl.CostEstimate(flops=flops, transcendentals=0,
                                      bytes_accessed=bytes_accessed),
    )(x, w1, b1, w2, b2, w3, b3)

    return out[:B, :out_features]


# ----------------------------------------------------------------------------
# JAX-side module mirroring FeatureExtractionPretrained
# ----------------------------------------------------------------------------
class FeatureExtractionPretrainedPallas:
    """JAX/Pallas analogue of FeatureExtractionPretrained with an MLP encoder."""

    def __init__(self, freqlen, seqlen, upstream_config):
        self.freqlen = freqlen
        self.seqlen = seqlen
        self.Network_config = upstream_config
        self.selected_model = upstream_config["SelectedAENetwork"]
        cfg = upstream_config[self.selected_model]
        h1, h2, latent = cfg["hidden1"], cfg["hidden2"], cfg["latent"]
        dt = freqlen * seqlen

        # Deterministic parameter init (synthetic weights; checkpoint
        # load/save of the original module is host I/O, not kernel work).
        # TODO(synk): load_model/add_state_to_save (torch state_dict I/O) have
        # no Pallas equivalent and are not implemented.
        key = jax.random.PRNGKey(0)
        k1, k2, k3 = jax.random.split(key, 3)
        scale = lambda fan_in: 1.0 / jnp.sqrt(jnp.float32(fan_in))
        self.params = {
            "w1": jax.random.normal(k1, (dt, h1), jnp.float32) * scale(dt),
            "b1": jnp.zeros((1, h1), jnp.float32),
            "w2": jax.random.normal(k2, (h1, h2), jnp.float32) * scale(h1),
            "b2": jnp.zeros((1, h2), jnp.float32),
            "w3": jax.random.normal(k3, (h2, latent), jnp.float32) * scale(h2),
            "b3": jnp.zeros((1, latent), jnp.float32),
        }
        self.latent = latent

        # Cache padded + bf16-cast kernel operands ONCE (perf feedback: avoid
        # per-call pad/cast HBM traffic), and jit the whole forward path.
        self._packed = jax.tree_util.tree_map(jnp.asarray,
                                              pack_encoder_params(self.params))
        self._forward_fn = jax.jit(
            functools.partial(mlp_encoder_forward, out_features=latent))

    def forward(self, data, selected_encoded_layers=-1):
        """data: [B, D, T] float tensor -> [B, H] latent representation."""
        # TODO(synk): `selected_encoded_layers` as a list (concatenating
        # intermediate-layer activations) is config-dependent upstream; only
        # the default -1 (last encoder layer) path is implemented.
        assert selected_encoded_layers == -1
        return self._forward_fn(data, self._packed)

    def get_feature_dimension(self, selected_encoded_layers=-1):
        # Static shape query; no need to run a dummy B=10 forward.
        assert selected_encoded_layers == -1
        return int(self.latent)


# ----------------------------------------------------------------------------
# Pure-JAX f32 reference for the correctness check
# ----------------------------------------------------------------------------
def _reference_forward(data, params, freqlen, seqlen):
    B = data.shape[0]
    x = data.reshape(B, freqlen * seqlen).astype(jnp.float32)
    h1 = jnp.maximum(x @ params["w1"] + params["b1"], 0.0)
    h2 = jnp.maximum(h1 @ params["w2"] + params["b2"], 0.0)
    return h2 @ params["w3"] + params["b3"]


if __name__ == "__main__":
    # Small shapes consistent with the module: input [B x D x T].
    B, FREQ, SEQ = 2, 16, 8
    config = {
        "SelectedAENetwork": "MLP",
        "MLP": {"hidden1": 64, "hidden2": 64, "latent": 32},
    }

    module = FeatureExtractionPretrainedPallas(FREQ, SEQ, config)

    data = jax.random.normal(jax.random.PRNGKey(0), (B, FREQ, SEQ), jnp.float32)
    out = jax.block_until_ready(module.forward(data, selected_encoded_layers=-1))
    ref = _reference_forward(data, module.params, FREQ, SEQ)
    assert out.shape == (B, config["MLP"]["latent"])
    # bf16 MXU inputs with f32 accumulation -> loose tolerance vs f32 ref.
    assert jnp.allclose(out, ref, atol=5e-2, rtol=5e-2), "mismatch vs reference"
    assert module.get_feature_dimension() == config["MLP"]["latent"]

    # Exercise the row-padding path (B=10 -> single padded 32-row batch tile).
    data2 = jax.random.normal(jax.random.PRNGKey(1), (10, FREQ, SEQ), jnp.float32)
    out2 = jax.block_until_ready(module.forward(data2))
    ref2 = _reference_forward(data2, module.params, FREQ, SEQ)
    assert out2.shape == (10, config["MLP"]["latent"])
    assert jnp.allclose(out2, ref2, atol=5e-2, rtol=5e-2), "mismatch (padded batch)"

    print("KERNEL_OK")
</pallas_src>

<mosaic_0001>
module attributes {stable_mosaic.version = 11 : i64} {
  func.func @_mlp_encoder_kernel(%arg0: i32, %arg1: i32, %arg2: memref<32x128xf32, #tpu.memory_space<vmem>>, %arg3: memref<128x128xbf16, #tpu.memory_space<vmem>>, %arg4: memref<1x128xf32, #tpu.memory_space<vmem>>, %arg5: memref<128x128xbf16, #tpu.memory_space<vmem>>, %arg6: memref<1x128xf32, #tpu.memory_space<vmem>>, %arg7: memref<128x128xbf16, #tpu.memory_space<vmem>>, %arg8: memref<1x128xf32, #tpu.memory_space<vmem>>, %arg9: memref<32x128xf32, #tpu.memory_space<vmem>>, %arg10: memref<32x128xf32, #tpu.memory_space<vmem>>) attributes {dimension_semantics = [#tpu.dimension_semantics<parallel>, #tpu.dimension_semantics<arbitrary>], iteration_bounds = array<i64: 1, 1>, scalar_prefetch = 0 : i64, scratch_operands = 1 : i64, tpu.core_type = #tpu.core_type<tc>, window_params = [{transform_indices = @transform_0, window_bounds = array<i64: 32, 128>}, {transform_indices = @transform_1, window_bounds = array<i64: 128, 128>}, {pipeline_mode = #tpu.pipeline_mode<synchronous>, transform_indices = @transform_2, window_bounds = array<i64: 1, 128>}, {pipeline_mode = #tpu.pipeline_mode<synchronous>, transform_indices = @transform_3, window_bounds = array<i64: 128, 128>}, {pipeline_mode = #tpu.pipeline_mode<synchronous>, transform_indices = @transform_4, window_bounds = array<i64: 1, 128>}, {pipeline_mode = #tpu.pipeline_mode<synchronous>, transform_indices = @transform_5, window_bounds = array<i64: 128, 128>}, {pipeline_mode = #tpu.pipeline_mode<synchronous>, transform_indices = @transform_6, window_bounds = array<i64: 1, 128>}, {transform_indices = @transform_7, window_bounds = array<i64: 32, 128>}]} {
    %c0_i32 = arith.constant 0 : i32
    %0 = arith.cmpi eq, %arg1, %c0_i32 : i32
    %1 = arith.extui %0 : i1 to i32
    %c0_i32_0 = arith.constant 0 : i32
    %2 = arith.cmpi ne, %1, %c0_i32_0 : i32
    scf.if %2 {
      %cst_10 = arith.constant 0.000000e+00 : f32
      %13 = vector.broadcast %cst_10 : f32 to vector<32x128xf32>
      %c0_11 = arith.constant 0 : index
      %c0_12 = arith.constant 0 : index
      %14 = vector.load %arg10[%c0_11, %c0_12] : memref<32x128xf32, #tpu.memory_space<vmem>>, vector<32x128xf32>
      tpu.vector_store %arg10[%c0_11, %c0_12], %13 {strides = array<i32>} : memref<32x128xf32, #tpu.memory_space<vmem>>, vector<32x128xf32>,
    } else {
    }
    %c0 = arith.constant 0 : index
    %c0_1 = arith.constant 0 : index
    %3 = vector.load %arg2[%c0, %c0_1] : memref<32x128xf32, #tpu.memory_space<vmem>>, vector<32x128xf32>
    %4 = arith.truncf %3 : vector<32x128xf32> to vector<32x128xbf16>
    %c0_2 = arith.constant 0 : index
    %c0_3 = arith.constant 0 : index
    %5 = vector.load %arg10[%c0_2, %c0_3] : memref<32x128xf32, #tpu.memory_space<vmem>>, vector<32x128xf32>
    %c0_4 = arith.constant 0 : index
    %c0_5 = arith.constant 0 : index
    %6 = vector.load %arg3[%c0_4, %c0_5] : memref<128x128xbf16, #tpu.memory_space<vmem>>, vector<128x128xbf16>
    %cst = arith.constant dense<0.000000e+00> : vector<32x128xf32>
    %7 = tpu.matmul %4, %6, %cst {dimension_numbers = #tpu.dot_dimension_numbers<[1], [0], [0], [1], [0, 0, 1, 1], [], []>} : vector<32x128xbf16>, vector<128x128xbf16>, vector<32x128xf32> -> vector<32x128xf32>
    %8 = arith.addf %5, %7 : vector<32x128xf32>
    %c0_6 = arith.constant 0 : index
    %c0_7 = arith.constant 0 : index
    %9 = vector.load %arg10[%c0_6, %c0_7] : memref<32x128xf32, #tpu.memory_space<vmem>>, vector<32x128xf32>
    tpu.vector_store %arg10[%c0_6, %c0_7], %8 {strides = array<i32>} : memref<32x128xf32, #tpu.memory_space<vmem>>, vector<32x128xf32>,
    %c0_i32_8 = arith.constant 0 : i32
    %10 = arith.cmpi eq, %arg1, %c0_i32_8 : i32
    %11 = arith.extui %10 : i1 to i32
    %c0_i32_9 = arith.constant 0 : i32
    %12 = arith.cmpi ne, %11, %c0_i32_9 : i32
    scf.if %12 {
      %c0_10 = arith.constant 0 : index
      %c0_11 = arith.constant 0 : index
      %13 = vector.load %arg10[%c0_10, %c0_11] : memref<32x128xf32, #tpu.memory_space<vmem>>, vector<32x128xf32>
      %c0_12 = arith.constant 0 : index
      %c0_13 = arith.constant 0 : index
      %14 = vector.load %arg4[%c0_12, %c0_13] : memref<1x128xf32, #tpu.memory_space<vmem>>, vector<1x128xf32>
      %15 = vector.broadcast %14 : vector<1x128xf32> to vector<32x128xf32>
      %16 = arith.addf %13, %15 : vector<32x128xf32>
      %cst_14 = arith.constant 0.000000e+00 : f32
      %17 = vector.broadcast %cst_14 : f32 to vector<32x128xf32>
      %18 = arith.maximumf %16, %17 : vector<32x128xf32>
      %19 = arith.truncf %18 : vector<32x128xf32> to vector<32x128xbf16>
      %c0_15 = arith.constant 0 : index
      %c0_16 = arith.constant 0 : index
      %20 = vector.load %arg5[%c0_15, %c0_16] : memref<128x128xbf16, #tpu.memory_space<vmem>>, vector<128x128xbf16>
      %cst_17 = arith.constant dense<0.000000e+00> : vector<32x128xf32>
      %21 = tpu.matmul %19, %20, %cst_17 {dimension_numbers = #tpu.dot_dimension_numbers<[1], [0], [0], [1], [0, 0, 1, 1], [], []>} : vector<32x128xbf16>, vector<128x128xbf16>, vector<32x128xf32> -> vector<32x128xf32>
      %c0_18 = arith.constant 0 : index
      %c0_19 = arith.constant 0 : index
      %22 = vector.load %arg6[%c0_18, %c0_19] : memref<1x128xf32, #tpu.memory_space<vmem>>, vector<1x128xf32>
      %23 = vector.broadcast %22 : vector<1x128xf32> to vector<32x128xf32>
      %24 = arith.addf %21, %23 : vector<32x128xf32>
      %cst_20 = arith.constant 0.000000e+00 : f32
      %25 = vector.broadcast %cst_20 : f32 to vector<32x128xf32>
      %26 = arith.maximumf %24, %25 : vector<32x128xf32>
      %27 = arith.truncf %26 : vector<32x128xf32> to vector<32x128xbf16>
      %c0_21 = arith.constant 0 : index
      %c0_22 = arith.constant 0 : index
      %28 = vector.load %arg7[%c0_21, %c0_22] : memref<128x128xbf16, #tpu.memory_space<vmem>>, vector<128x128xbf16>
      %cst_23 = arith.constant dense<0.000000e+00> : vector<32x128xf32>
      %29 = tpu.matmul %27, %28, %cst_23 {dimension_numbers = #tpu.dot_dimension_numbers<[1], [0], [0], [1], [0, 0, 1, 1], [], []>} : vector<32x128xbf16>, vector<128x128xbf16>, vector<32x128xf32> -> vector<32x128xf32>
      %c0_24 = arith.constant 0 : index
      %c0_25 = arith.constant 0 : index
      %30 = vector.load %arg8[%c0_24, %c0_25] : memref<1x128xf32, #tpu.memory_space<vmem>>, vector<1x128xf32>
      %31 = vector.broadcast %30 : vector<1x128xf32> to vector<32x128xf32>
      %32 = arith.addf %29, %31 : vector<32x128xf32>
      %c0_26 = arith.constant 0 : index
      %c0_27 = arith.constant 0 : index
      %33 = vector.load %arg9[%c0_26, %c0_27] : memref<32x128xf32, #tpu.memory_space<vmem>>, vector<32x128xf32>
      tpu.vector_store %arg9[%c0_26, %c0_27], %32 {strides = array<i32>} : memref<32x128xf32, #tpu.memory_space<vmem>>, vector<32x128xf32>,
    } else {
    }
    return
  }
  func.func @transform_0(%arg0: i32, %arg1: i32) -> (i32, i32) {
    %c0_i32 = arith.constant 0 : i32
    return %arg0, %arg1 : i32, i32
  }
  func.func @transform_1(%arg0: i32, %arg1: i32) -> (i32, i32) {
    %c0_i32 = arith.constant 0 : i32
    %c0_i32_0 = arith.constant 0 : i32
    return %arg1, %c0_i32 : i32, i32
  }
  func.func @transform_2(%arg0: i32, %arg1: i32) -> (i32, i32) {
    %c0_i32 = arith.constant 0 : i32
    %c0_i32_0 = arith.constant 0 : i32
    %c0_i32_1 = arith.constant 0 : i32
    return %c0_i32, %c0_i32_0 : i32, i32
  }
  func.func @transform_3(%arg0: i32, %arg1: i32) -> (i32, i32) {
    %c0_i32 = arith.constant 0 : i32
    %c0_i32_0 = arith.constant 0 : i32
    %c0_i32_1 = arith.constant 0 : i32
    return %c0_i32, %c0_i32_0 : i32, i32
  }
  func.func @transform_4(%arg0: i32, %arg1: i32) -> (i32, i32) {
    %c0_i32 = arith.constant 0 : i32
    %c0_i32_0 = arith.constant 0 : i32
    %c0_i32_1 = arith.constant 0 : i32
    return %c0_i32, %c0_i32_0 : i32, i32
  }
  func.func @transform_5(%arg0: i32, %arg1: i32) -> (i32, i32) {
    %c0_i32 = arith.constant 0 : i32
    %c0_i32_0 = arith.constant 0 : i32
    %c0_i32_1 = arith.constant 0 : i32
    return %c0_i32, %c0_i32_0 : i32, i32
  }
  func.func @transform_6(%arg0: i32, %arg1: i32) -> (i32, i32) {
    %c0_i32 = arith.constant 0 : i32
    %c0_i32_0 = arith.constant 0 : i32
    %c0_i32_1 = arith.constant 0 : i32
    return %c0_i32, %c0_i32_0 : i32, i32
  }
  func.func @transform_7(%arg0: i32, %arg1: i32) -> (i32, i32) {
    %c0_i32 = arith.constant 0 : i32
    %c0_i32_0 = arith.constant 0 : i32
    return %arg0, %c0_i32 : i32, i32
  }
}

</mosaic_0001>

<bundles_post_ra>
// kernel: mlp_encoder_forward.1
= control target key start
LH: loop header
LB: loop body
LE: loop exit
PB: predicated region body
PF: predicated region fallthrough
CT: control target
= control target key end

     0   :  { %12 = vsyncpa [#allocation4], 0  ;;  %s672_s0 = inlined_call_operand.vmem [shape: f32[32,128], index: 0, kind: input, shape index: {}]   ;;  %s673_s1 = inlined_call_operand.vmem [shape: bf16[128,128], index: 1, kind: input, shape index: {}]   ;;  %s674_s2 = inlined_call_operand.vmem [shape: f32[1,128], index: 2, kind: input, shape index: {}]   ;;  %s675_s3 = inlined_call_operand.hbm [shape: bf16[128,128], index: 3, kind: input, shape index: {}]   ;;  %s676_s4 = inlined_call_operand.vmem [shape: f32[1,128], index: 4, kind: input, shape index: {}]   ;;  %s677_s5 = inlined_call_operand.hbm [shape: bf16[128,128], index: 5, kind: input, shape index: {}]   ;;  %s678_s6 = inlined_call_operand.vmem [shape: f32[1,128], index: 6, kind: input, shape index: {}]   ;;  %s679_s7 = inlined_call_operand.vmem [shape: f32[32,128], index: 7, kind: output, shape index: {}]  }
   0x1   :  { %s24_s26 = sshll.u32 %s675_s3, 4  ;;  %s25_s26 = int_to_ptr.hbm [resolvable:$true] %s24_s26 }
   0x2   :  { %13 = vsyncpa [#allocation6], 0  ;;  %s565_s27 = smov [#allocation3]   ;;  %s39_s8 = sshll.u32 %s677_s5, 4  ;;  %s40_s8 = int_to_ptr.hbm [resolvable:$true] %s39_s8 }
   0x3   :  { %s26_s28 = sshll.u32 %s565_s27, 4  ;;  %s566_s9 = smov 64   ;;  %s27_s28 = int_to_ptr.vmem [resolvable:$true] %s26_s28 }
   0x4   :  { %s567_s10 = smov 4   ;;  %s568_s11 = smov [#allocation5]  }
   0x5   :  { %32 = dma.hbm_to_vmem [thread:$0]  %s25_s26, 1024, %s27_s28, [#allocation4], %s566_s9, %s566_s9, %s567_s10  }
   0x6   :  { %s41_s12 = sshll.u32 %s568_s11, 4  ;;  %s42_s12 = int_to_ptr.vmem [resolvable:$true] %s41_s12 }
   0x7   :  { %47 = dma.hbm_to_vmem [thread:$0]  %s40_s8, 1024, %s42_s12, [#allocation6], %s566_s9, %s566_s9, %s567_s10  }
   0x8   :  { %561 = dma.done.wait [#allocation4], 1024  }
   0x9   :  { %562 = vsyncadd [#allocation4], 4294966272 }
   0xa   :  { %563 = dma.done.wait [#allocation6], 1024  }
   0xb   :  { %564 = vsyncadd [#allocation6], 4294966272  ;;  %v481_v0 = vld [vmem:[%s673_s1 + $0x38] sm:$0xff]  ;;  %v480_v1 = vld [vmem:[%s673_s1 + $0x30] sm:$0xff] }
   0xc   :  { %140 = vmatpush.bf16.msra.mxu0 %v481_v0  ;;  %498 = vmatpush.bf16.msra.mxu3 %v481_v0  ;;  %v489_v2 = vld [vmem:[#allocation3 + $0x38] sm:$0xff]  ;;  %v479_v3 = vld [vmem:[%s673_s1 + $0x28] sm:$0xff]  ;;  %v488_v4 = vld [vmem:[#allocation3 + $0x30] sm:$0xff] }
   0xd   :  { %256 = vmatpush.bf16.msra.mxu1 %v489_v2  ;;  %v478_v5 = vld [vmem:[%s673_s1 + $0x20] sm:$0xff]  ;;  %v487_v6 = vld [vmem:[#allocation3 + $0x28] sm:$0xff]  ;;  %v477_v7 = vld [vmem:[%s673_s1 + $0x18] sm:$0xff] }
   0xe   :  { %v486_v8 = vld [vmem:[#allocation3 + $0x20] sm:$0xff]  ;;  %v476_v9 = vld [vmem:[%s673_s1 + $0x10] sm:$0xff]  ;;  %v475_v10 = vld [vmem:[%s673_s1 + $0x8] sm:$0xff] }
   0xf   :  { %v474_v11 = vld [vmem:[%s673_s1] sm:$0xff]  ;;  %v67_v13 = vld [vmem:[%s672_s0 + $0x8] sm:$0xff]  ;;  %v68_v14 = vld [vmem:[%s672_s0 + $0x10] sm:$0xff] }
  0x10   :  { %141 = vmatpush.bf16.msra.mxu0 %v480_v1  ;;  %499 = vmatpush.bf16.msra.mxu3 %v480_v1  ;;  %v66_v12 = vld [vmem:[%s672_s0] sm:$0xff]  ;;  %v69_v15 = vld [vmem:[%s672_s0 + $0x18] sm:$0xff]  ;;  %v484_v19 = vld [vmem:[#allocation3 + $0x10] sm:$0xff] }
  0x11   :  { %257 = vmatpush.bf16.msra.mxu1 %v488_v4  ;;  %v70_v16 = vpack.c.bf16 %v67_v13, %v66_v12  ;;  %v71_v17 = vpack.c.bf16 %v69_v15, %v68_v14  ;;  %v485_v18 = vld [vmem:[#allocation3 + $0x18] sm:$0xff]  ;;  %v483_v20 = vld [vmem:[#allocation3 + $0x8] sm:$0xff]  ;;  %v482_v21 = vld [vmem:[#allocation3] sm:$0xff] }
  0x12   :  { %v497_v22 = vld [vmem:[#allocation5 + $0x38] sm:$0xff]  ;;  %v496_v24 = vld [vmem:[#allocation5 + $0x30] sm:$0xff]  ;;  %v510_v25 = vld [vmem:[%s674_s2] ss:$0 sm:$0xff] }
  0x13   :  { %349 = vmatpush.bf16.msra.mxu2 %v497_v22  ;;  %v495_v26 = vld [vmem:[#allocation5 + $0x28] sm:$0xff]  ;;  %v494_v31 = vld [vmem:[#allocation5 + $0x20] sm:$0xff]  ;;  %v493_v41 = vld [vmem:[#allocation5 + $0x18] sm:$0xff] }
  0x14   :  { %142 = vmatpush.bf16.msra.mxu0 %v479_v3  ;;  %500 = vmatpush.bf16.msra.mxu3 %v479_v3  ;;  %v492_v42 = vld [vmem:[#allocation5 + $0x10] sm:$0xff]  ;;  %v491_v43 = vld [vmem:[#allocation5 + $0x8] sm:$0xff]  ;;  %v490_v44 = vld [vmem:[#allocation5] sm:$0xff] }
  0x15   :  { %258 = vmatpush.bf16.msra.mxu1 %v487_v6  ;;  %v511_v46 = vld [vmem:[%s676_s4] ss:$0 sm:$0xff] }
  0x16   :  { %v512_v60 = vld [vmem:[%s678_s6] ss:$0 sm:$0xff] }
  0x17   :  { %350 = vmatpush.bf16.msra.mxu2 %v496_v24 }
  0x18   :  { %143 = vmatpush.bf16.msra.mxu0 %v478_v5  ;;  %501 = vmatpush.bf16.msra.mxu3 %v478_v5 }
  0x19   :  { %259 = vmatpush.bf16.msra.mxu1 %v486_v8 }
  0x1b   :  { %351 = vmatpush.bf16.msra.mxu2 %v495_v26 }
  0x1c   :  { %144 = vmatpush.bf16.msra.mxu0 %v477_v7  ;;  %502 = vmatpush.bf16.msra.mxu3 %v477_v7 }
  0x1d   :  { %260 = vmatpush.bf16.msra.mxu1 %v485_v18 }
  0x1f   :  { %352 = vmatpush.bf16.msra.mxu2 %v494_v31 }
  0x20   :  { %145 = vmatpush.bf16.msra.mxu0 %v476_v9  ;;  %503 = vmatpush.bf16.msra.mxu3 %v476_v9 }
  0x21   :  { %261 = vmatpush.bf16.msra.mxu1 %v484_v19 }
  0x23   :  { %353 = vmatpush.bf16.msra.mxu2 %v493_v41 }
  0x24   :  { %146 = vmatpush.bf16.msra.mxu0 %v475_v10  ;;  %504 = vmatpush.bf16.msra.mxu3 %v475_v10 }
  0x25   :  { %262 = vmatpush.bf16.msra.mxu1 %v483_v20 }
  0x27   :  { %354 = vmatpush.bf16.msra.mxu2 %v492_v42 }
  0x28   :  { %147 = vmatpush.bf16.msra.mxu0 %v474_v11  ;;  %505 = vmatpush.bf16.msra.mxu3 %v474_v11 }
  0x29   :  { %263 = vmatpush.bf16.msra.mxu1 %v482_v21 }
  0x2b   :  { %148 = vmatmul.bf16.vlgmr.msra.gmra.mxu0 %v70_v16  ;;  %153 = vmatmul.bf16.vlgmr.msra.gmra.mxu3 %v71_v17 }
  0x2c   :  { %355 = vmatpush.bf16.msra.mxu2 %v491_v43 }
  0x30   :  { %356 = vmatpush.bf16.msra.mxu2 %v490_v44 }
  0xa8   :  { %v149_v23 = vpop.f32.mrf.mxu0 }
  0xa9   :  { %v178_v27 = vadd.f32 %v510_v25, %v149_v23 }
  0xab   :  { %v182_v32 = vmax.f32 %v178_v27, 0.0 }
  0xae   :  { %v154_v29 = vpop.f32.mrf.mxu3 }
  0xaf   :  { %v180_v36 = vadd.f32 %v510_v25, %v154_v29 }
  0xb0   :  { %v151_v28 = vpop.f32.mrf.mxu0 }
  0xb1   :  { %v179_v30 = vadd.f32 %v510_v25, %v151_v28  ;;  %v184_v38 = vmax.f32 %v180_v36, 0.0 }
  0xb3   :  { %v183_v33 = vmax.f32 %v179_v30, 0.0 }
  0xb5   :  { %v186_v34 = vpack.c.bf16 %v183_v33, %v182_v32 }
  0xb6   :  { %v156_v35 = vpop.f32.mrf.mxu3 }
  0xb7   :  { %264 = vmatmul.bf16.vlgmr.msra.gmra.mxu1 %v186_v34  ;;  %v181_v37 = vadd.f32 %v510_v25, %v156_v35 }
  0xb9   :  { %v185_v39 = vmax.f32 %v181_v37, 0.0 }
  0xbb   :  { %v187_v40 = vpack.c.bf16 %v185_v39, %v184_v38 }
  0xc7   :  { %269 = vmatmul.bf16.gmra.mxu1 %v187_v40 }
 0x134   :  { %v265_v45 = vpop.f32.mrf.mxu1 }
 0x135   :  { %v266_v47 = vadd.f32 %v511_v46, %v265_v45 }
 0x137   :  { %v275_v50 = vmax.f32 %v266_v47, 0.0 }
 0x13c   :  { %v267_v48 = vpop.f32.mrf.mxu1 }
 0x13d   :  { %v268_v49 = vadd.f32 %v511_v46, %v267_v48 }
 0x13f   :  { %v276_v51 = vmax.f32 %v268_v49, 0.0 }
 0x141   :  { %v279_v52 = vpack.c.bf16 %v276_v51, %v275_v50 }
 0x143   :  { %357 = vmatmul.bf16.vlgmr.msra.gmra.mxu2 %v279_v52 }
 0x144   :  { %v270_v53 = vpop.f32.mrf.mxu1 }
 0x145   :  { %v271_v54 = vadd.f32 %v511_v46, %v270_v53 }
 0x147   :  { %v277_v57 = vmax.f32 %v271_v54, 0.0 }
 0x14c   :  { %v272_v55 = vpop.f32.mrf.mxu1 }
 0x14d   :  { %v273_v56 = vadd.f32 %v511_v46, %v272_v55 }
 0x14f   :  { %v278_v58 = vmax.f32 %v273_v56, 0.0 }
 0x151   :  { %v280_v59 = vpack.c.bf16 %v278_v58, %v277_v57 }
 0x153   :  { %362 = vmatmul.bf16.gmra.mxu2 %v280_v59 }
 0x1c6   :  { %v358_v61 = vpop.f32.mrf.mxu2 }
 0x1c7   :  { %v359_v62 = vadd.f32 %v512_v60, %v358_v61 }
 0x1c9   :  { %368 = vst [vmem:[%s679_s7] sm:$0xff] %v359_v62 }
 0x1ce   :  { %v360_v63 = vpop.f32.mrf.mxu2 }
 0x1cf   :  { %v361_v0 = vadd.f32 %v512_v60, %v360_v63 }
 0x1d1   :  { %369 = vst [vmem:[%s679_s7 + $0x8] sm:$0xff] %v361_v0 }
 0x1d6   :  { %v363_v1 = vpop.f32.mrf.mxu2 }
 0x1d7   :  { %v364_v2 = vadd.f32 %v512_v60, %v363_v1 }
 0x1d9   :  { %370 = vst [vmem:[%s679_s7 + $0x10] sm:$0xff] %v364_v2 }
 0x1de   :  { %v365_v3 = vpop.f32.mrf.mxu2 }
 0x1df   :  { %v366_v4 = vadd.f32 %v512_v60, %v365_v3 }
 0x1e1   :  { %371 = vst [vmem:[%s679_s7 + $0x18] sm:$0xff] %v366_v4 }
 0x1e2   :  { %376 = vsyncpa [#allocation4], 1 }
 0x1e3   :  { %377 = vsyncpa [#allocation6], 1 }

</bundles_post_ra>
